<compile_context>
chip_gen: v5e
topology: v5e:2x2
jax: 0.10.0
libtpu: 0.0.40
codegen_flags: <defaults>
</compile_context>

<pallas_src>
import functools
import math

import jax
import jax.numpy as jnp
from jax.experimental import pallas as pl
from jax.experimental.pallas import tpu as pltpu


def _causal_kernel(y_ref, wcat_ref, bcat_ref, azT_ref, prior_ref, m_ref, out_ref,
                   *, emb, inv_sqrt_e, n_max, num_classes):
    y = y_ref[...]                                                    # [N_max, R]

    # Fused y-side matmul: one MXU pass yields the attention query (ay) and the y-half of
    # the causal logits (ly); the (by | bc) biases are folded into a single broadcast add.
    yw = jnp.dot(y, wcat_ref[...], preferred_element_type=jnp.float32) + bcat_ref[...]
    ay = yw[:, :emb]                                                  # [N_max, E]
    ly = yw[:, emb:]                                                  # [N_max, C]  (+ bc)

    # attention = softmax((Wy y) (Wz dic)^T / sqrt(E), axis=1); az is pre-transposed [E, D].
    logits = jnp.dot(ay, azT_ref[...], preferred_element_type=jnp.float32) * inv_sqrt_e
    logits = logits - jnp.max(logits, axis=1, keepdims=True)
    att = jnp.exp(logits)
    att = att * pl.reciprocal(jnp.sum(att, axis=1, keepdims=True), approx=True)

    # lz_j = ((att_j * prior) @ dic) @ Wc_z^T  folded to  (att_j * prior) @ (dic @ Wc_z^T).
    lz = jnp.dot(att * prior_ref[...], m_ref[...],
                 preferred_element_type=jnp.float32)                  # [N_max, C]

    # Lane-dense output: row i = [ ly_i + lz_0 | ly_i + lz_1 | ... | ly_i + lz_{N-1} ].
    out_ref[...] = jnp.concatenate(
        [ly + lz[j:j + 1, :] for j in range(n_max)], axis=1)          # [N_max, N_max*C]


def _batched_causal_call(x_padded, wcat, bcat, azT, prior, m, *, n_max):
    num_images = x_padded.shape[0] // n_max
    r = x_padded.shape[1]
    e, d = azT.shape
    c = m.shape[1]
    kernel = functools.partial(_causal_kernel, emb=e, inv_sqrt_e=1.0 / math.sqrt(e),
                               n_max=n_max, num_classes=c)

    def const(shape):
        # Constant block index -> operand stays resident in VMEM across the image grid.
        return pl.BlockSpec(shape, lambda i: (0, 0))

    return pl.pallas_call(
        kernel,
        out_shape=jax.ShapeDtypeStruct((num_images * n_max, n_max * c), jnp.float32),
        grid=(num_images,),
        in_specs=[
            pl.BlockSpec((n_max, r), lambda i: (i, 0)),   # per-image padded y tile
            const((r, e + c)),                            # [Wy^T | Wc_y^T]
            const((1, e + c)),                            # [by   | bc   ]
            const((e, d)),                                # (dic @ Wz^T + bz)^T
            const((1, d)),                                # prior
            const((d, c)),                                # dic @ Wc_z^T
        ],
        out_specs=pl.BlockSpec((n_max, n_max * c), lambda i: (i, 0)),
        compiler_params=pltpu.CompilerParams(dimension_semantics=("parallel",)),
    )(x_padded, wcat, bcat, azT, prior, m)


@functools.partial(jax.jit, static_argnums=(1, 2))
def _causal_forward_padded(x, box_sizes, n_max, params):
    """Precompute dic-only terms, pad per-image rows to n_max, run the gridded kernel."""
    hi = jax.lax.Precision.HIGHEST
    r = x.shape[1]
    dic = params["dic"]                      # [D, R]
    prior = params["prior"]                  # [D]
    wy_w, wy_b = params["wy_w"], params["wy_b"]   # [E, R], [E]
    wz_w, wz_b = params["wz_w"], params["wz_b"]   # [E, R], [E]
    wc_w, wc_b = params["wc_w"], params["wc_b"]   # [C, 2R], [C]
    e = wy_w.shape[0]
    c = wc_w.shape[0]
    d = dic.shape[0]

    # Hoisted, image-independent precompute (shared across the whole grid).
    azT = (jnp.dot(dic, wz_w.T, precision=hi) + wz_b).T          # [E, D]
    m = jnp.dot(dic, wc_w[:, r:].T, precision=hi)                # [D, C]
    wcat = jnp.concatenate([wy_w.T, wc_w[:, :r].T], axis=1)      # [R, E+C]
    bcat = jnp.concatenate([wy_b, wc_b]).reshape(1, e + c)       # [1, E+C]
    prior2 = prior.reshape(1, d)

    # Pad each image's rows to n_max (zero rows; their outputs are discarded by the caller).
    num_images = len(box_sizes)
    x_padded = jnp.zeros((num_images * n_max, r), x.dtype)
    start = 0
    for img, n in enumerate(box_sizes):
        chunk = jax.lax.slice(x, (start, 0), (start + n, r))
        x_padded = jax.lax.dynamic_update_slice(x_padded, chunk, (img * n_max, 0))
        start += n

    return _batched_causal_call(x_padded, wcat, bcat, azT, prior2, m, n_max=n_max)


def causal_predictor_forward(x, box_sizes, params):
    """Mirrors forward(x, proposals): returns a list of [N_i^2, C] causal logits per image."""
    box_sizes = tuple(int(n) for n in box_sizes)
    n_max = max(8, -(-max(box_sizes) // 8) * 8)      # pad boxes to a multiple of 8 sublanes
    c = params["wc_w"].shape[0]
    out = _causal_forward_padded(x, box_sizes, n_max, params)   # [num_images*n_max, n_max*C]
    outs = []
    for img, n in enumerate(box_sizes):
        blk = out[img * n_max:(img + 1) * n_max].reshape(n_max, n_max, c)
        outs.append(blk[:n, :n, :].reshape(n * n, c))            # row order = i*n + j
    return outs


def _reference_forward(x, box_sizes, wy_w, wy_b, wz_w, wz_b, wc_w, wc_b, dic, prior, emb):
    """Plain-JAX transcription of the PyTorch forward."""
    hi = jax.lax.Precision.HIGHEST
    outs = []
    start = 0
    for n in box_sizes:
        y = x[start:start + n]
        start += n
        att = jnp.dot(jnp.dot(y, wy_w.T, precision=hi) + wy_b,
                      (jnp.dot(dic, wz_w.T, precision=hi) + wz_b).T,
                      precision=hi) / emb ** 0.5
        att = jax.nn.softmax(att, axis=1)
        z_hat = att[:, :, None] * dic[None]
        z = jnp.einsum("d,ndr->nr", prior, z_hat, precision=hi)
        xz = jnp.concatenate(
            [jnp.repeat(y[:, None, :], n, axis=1),
             jnp.repeat(z[None, :, :], n, axis=0)], axis=2).reshape(-1, 2 * y.shape[1])
        outs.append(jnp.dot(xz, wc_w.T, precision=hi) + wc_b)
    return outs


if __name__ == "__main__":
    # Small, module-consistent shapes.
    R = 128   # in_channels / representation_size
    E = 64    # cfg.MODEL.ROI_BOX_HEAD.EMBEDDING
    D = 16    # number of dictionary entries (np.load(DIC_FILE)[1:])
    C = 32    # cfg.MODEL.ROI_BOX_HEAD.NUM_CLASSES
    box_sizes = [8, 4]          # boxes per image (proposals), static glue
    total = sum(box_sizes)

    key = jax.random.PRNGKey(0)
    k = jax.random.split(key, 6)
    # Deterministic synthetic parameters matching __init__ shapes / init scheme.
    wc_w = 0.01 * jax.random.normal(k[0], (C, 2 * R), jnp.float32)   # causal_score.weight
    wy_w = 0.02 * jax.random.normal(k[1], (E, R), jnp.float32)       # Wy.weight
    wz_w = 0.02 * jax.random.normal(k[2], (E, R), jnp.float32)       # Wz.weight
    wy_b = jnp.zeros((E,), jnp.float32)                              # zero-init biases
    wz_b = jnp.zeros((E,), jnp.float32)
    wc_b = jnp.zeros((C,), jnp.float32)
    # TODO(synk): dic / prior come from np.load(cfg.DIC_FILE / cfg.PRIOR_PROB); synthesized here.
    dic = jax.random.normal(k[3], (D, R), jnp.float32)
    prior = jax.nn.softmax(jax.random.normal(k[4], (D,), jnp.float32))
    x = jax.random.normal(k[5], (total, R), jnp.float32)

    params = {
        "dic": dic, "prior": prior,
        "wy_w": wy_w, "wy_b": wy_b,
        "wz_w": wz_w, "wz_b": wz_b,
        "wc_w": wc_w, "wc_b": wc_b,
    }

    outs = causal_predictor_forward(x, box_sizes, params)
    outs = [jax.block_until_ready(o) for o in outs]

    refs = _reference_forward(x, box_sizes, wy_w, wy_b, wz_w, wz_b, wc_w, wc_b, dic, prior, E)
    for o, r, n in zip(outs, refs, box_sizes):
        assert o.shape == (n * n, C), o.shape
        assert jnp.allclose(o, r, rtol=2e-3, atol=2e-3), float(jnp.max(jnp.abs(o - r)))

    print("KERNEL_OK")
</pallas_src>

<mosaic_0001>
module attributes {stable_mosaic.version = 11 : i64} {
  func.func @_causal_kernel(%arg0: i32, %arg1: memref<8x128xf32, #tpu.memory_space<vmem>>, %arg2: memref<128x96xf32, #tpu.memory_space<vmem>>, %arg3: memref<1x96xf32, #tpu.memory_space<vmem>>, %arg4: memref<64x16xf32, #tpu.memory_space<vmem>>, %arg5: memref<1x16xf32, #tpu.memory_space<vmem>>, %arg6: memref<16x32xf32, #tpu.memory_space<vmem>>, %arg7: memref<8x256xf32, #tpu.memory_space<vmem>>) attributes {dimension_semantics = [#tpu.dimension_semantics<parallel>], iteration_bounds = array<i64: 2>, scalar_prefetch = 0 : i64, scratch_operands = 0 : i64, tpu.core_type = #tpu.core_type<tc>, window_params = [{transform_indices = @transform_0, window_bounds = array<i64: 8, 128>}, {pipeline_mode = #tpu.pipeline_mode<synchronous>, transform_indices = @transform_1, window_bounds = array<i64: 128, 96>}, {pipeline_mode = #tpu.pipeline_mode<synchronous>, transform_indices = @transform_2, window_bounds = array<i64: 1, 96>}, {pipeline_mode = #tpu.pipeline_mode<synchronous>, transform_indices = @transform_3, window_bounds = array<i64: 64, 16>}, {pipeline_mode = #tpu.pipeline_mode<synchronous>, transform_indices = @transform_4, window_bounds = array<i64: 1, 16>}, {pipeline_mode = #tpu.pipeline_mode<synchronous>, transform_indices = @transform_5, window_bounds = array<i64: 16, 32>}, {transform_indices = @transform_6, window_bounds = array<i64: 8, 256>}]} {
    %c0 = arith.constant 0 : index
    %c0_0 = arith.constant 0 : index
    %0 = vector.load %arg1[%c0, %c0_0] : memref<8x128xf32, #tpu.memory_space<vmem>>, vector<8x128xf32>
    %c0_1 = arith.constant 0 : index
    %c0_2 = arith.constant 0 : index
    %1 = vector.load %arg2[%c0_1, %c0_2] : memref<128x96xf32, #tpu.memory_space<vmem>>, vector<128x96xf32>
    %cst = arith.constant dense<0.000000e+00> : vector<8x96xf32>
    %2 = tpu.matmul %0, %1, %cst {dimension_numbers = #tpu.dot_dimension_numbers<[1], [0], [0], [1], [0, 0, 1, 1], [], []>} : vector<8x128xf32>, vector<128x96xf32>, vector<8x96xf32> -> vector<8x96xf32>
    %c0_3 = arith.constant 0 : index
    %c0_4 = arith.constant 0 : index
    %3 = vector.load %arg3[%c0_3, %c0_4] : memref<1x96xf32, #tpu.memory_space<vmem>>, vector<1x96xf32>
    %4 = vector.broadcast %3 : vector<1x96xf32> to vector<8x96xf32>
    %5 = arith.addf %2, %4 : vector<8x96xf32>
    %6 = vector.extract_strided_slice %5 {offsets = [0, 0], sizes = [8, 64], strides = [1, 1]} : vector<8x96xf32> to vector<8x64xf32>
    %7 = vector.extract_strided_slice %5 {offsets = [0, 64], sizes = [8, 32], strides = [1, 1]} : vector<8x96xf32> to vector<8x32xf32>
    %c0_5 = arith.constant 0 : index
    %c0_6 = arith.constant 0 : index
    %8 = vector.load %arg4[%c0_5, %c0_6] : memref<64x16xf32, #tpu.memory_space<vmem>>, vector<64x16xf32>
    %cst_7 = arith.constant dense<0.000000e+00> : vector<8x16xf32>
    %9 = tpu.matmul %6, %8, %cst_7 {dimension_numbers = #tpu.dot_dimension_numbers<[1], [0], [0], [1], [0, 0, 1, 1], [], []>} : vector<8x64xf32>, vector<64x16xf32>, vector<8x16xf32> -> vector<8x16xf32>
    %cst_8 = arith.constant 1.250000e-01 : f32
    %10 = vector.broadcast %cst_8 : f32 to vector<8x16xf32>
    %11 = arith.mulf %9, %10 : vector<8x16xf32>
    %cst_9 = arith.constant dense<0xFF800000> : vector<8xf32>
    %12 = vector.multi_reduction <maximumf>, %11, %cst_9 [1] : vector<8x16xf32> to vector<8xf32>
    %13 = vector.shape_cast %12 : vector<8xf32> to vector<8x1xf32>
    %14 = vector.broadcast %13 : vector<8x1xf32> to vector<8x16xf32>
    %15 = arith.subf %11, %14 : vector<8x16xf32>
    %16 = math.exp %15 : vector<8x16xf32>
    %cst_10 = arith.constant dense<0.000000e+00> : vector<8xf32>
    %17 = vector.multi_reduction <add>, %16, %cst_10 [1] : vector<8x16xf32> to vector<8xf32>
    %18 = vector.shape_cast %17 : vector<8xf32> to vector<8x1xf32>
    %19 = tpu.reciprocal %18 {approx = true} : vector<8x1xf32> -> vector<8x1xf32>
    %20 = vector.broadcast %19 : vector<8x1xf32> to vector<8x16xf32>
    %21 = arith.mulf %16, %20 : vector<8x16xf32>
    %c0_11 = arith.constant 0 : index
    %c0_12 = arith.constant 0 : index
    %22 = vector.load %arg5[%c0_11, %c0_12] : memref<1x16xf32, #tpu.memory_space<vmem>>, vector<1x16xf32>
    %23 = vector.broadcast %22 : vector<1x16xf32> to vector<8x16xf32>
    %24 = arith.mulf %21, %23 : vector<8x16xf32>
    %c0_13 = arith.constant 0 : index
    %c0_14 = arith.constant 0 : index
    %25 = vector.load %arg6[%c0_13, %c0_14] : memref<16x32xf32, #tpu.memory_space<vmem>>, vector<16x32xf32>
    %cst_15 = arith.constant dense<0.000000e+00> : vector<8x32xf32>
    %26 = tpu.matmul %24, %25, %cst_15 {dimension_numbers = #tpu.dot_dimension_numbers<[1], [0], [0], [1], [0, 0, 1, 1], [], []>} : vector<8x16xf32>, vector<16x32xf32>, vector<8x32xf32> -> vector<8x32xf32>
    %27 = vector.extract_strided_slice %26 {offsets = [0, 0], sizes = [1, 32], strides = [1, 1]} : vector<8x32xf32> to vector<1x32xf32>
    %28 = vector.broadcast %27 : vector<1x32xf32> to vector<8x32xf32>
    %29 = arith.addf %7, %28 : vector<8x32xf32>
    %30 = vector.extract_strided_slice %26 {offsets = [1, 0], sizes = [1, 32], strides = [1, 1]} : vector<8x32xf32> to vector<1x32xf32>
    %31 = vector.broadcast %30 : vector<1x32xf32> to vector<8x32xf32>
    %32 = arith.addf %7, %31 : vector<8x32xf32>
    %33 = vector.extract_strided_slice %26 {offsets = [2, 0], sizes = [1, 32], strides = [1, 1]} : vector<8x32xf32> to vector<1x32xf32>
    %34 = vector.broadcast %33 : vector<1x32xf32> to vector<8x32xf32>
    %35 = arith.addf %7, %34 : vector<8x32xf32>
    %36 = vector.extract_strided_slice %26 {offsets = [3, 0], sizes = [1, 32], strides = [1, 1]} : vector<8x32xf32> to vector<1x32xf32>
    %37 = vector.broadcast %36 : vector<1x32xf32> to vector<8x32xf32>
    %38 = arith.addf %7, %37 : vector<8x32xf32>
    %39 = vector.extract_strided_slice %26 {offsets = [4, 0], sizes = [1, 32], strides = [1, 1]} : vector<8x32xf32> to vector<1x32xf32>
    %40 = vector.broadcast %39 : vector<1x32xf32> to vector<8x32xf32>
    %41 = arith.addf %7, %40 : vector<8x32xf32>
    %42 = vector.extract_strided_slice %26 {offsets = [5, 0], sizes = [1, 32], strides = [1, 1]} : vector<8x32xf32> to vector<1x32xf32>
    %43 = vector.broadcast %42 : vector<1x32xf32> to vector<8x32xf32>
    %44 = arith.addf %7, %43 : vector<8x32xf32>
    %45 = vector.extract_strided_slice %26 {offsets = [6, 0], sizes = [1, 32], strides = [1, 1]} : vector<8x32xf32> to vector<1x32xf32>
    %46 = vector.broadcast %45 : vector<1x32xf32> to vector<8x32xf32>
    %47 = arith.addf %7, %46 : vector<8x32xf32>
    %48 = vector.extract_strided_slice %26 {offsets = [7, 0], sizes = [1, 32], strides = [1, 1]} : vector<8x32xf32> to vector<1x32xf32>
    %49 = vector.broadcast %48 : vector<1x32xf32> to vector<8x32xf32>
    %50 = arith.addf %7, %49 : vector<8x32xf32>
    %51 = tpu.concatenate %29, %32, %35, %38, %41, %44, %47, %50 in 1 : vector<8x32xf32>, vector<8x32xf32>, vector<8x32xf32>, vector<8x32xf32>, vector<8x32xf32>, vector<8x32xf32>, vector<8x32xf32>, vector<8x32xf32> -> vector<8x256xf32>
    %c0_16 = arith.constant 0 : index
    %c0_17 = arith.constant 0 : index
    %52 = vector.load %arg7[%c0_16, %c0_17] : memref<8x256xf32, #tpu.memory_space<vmem>>, vector<8x256xf32>
    tpu.vector_store %arg7[%c0_16, %c0_17], %51 {strides = array<i32>} : memref<8x256xf32, #tpu.memory_space<vmem>>, vector<8x256xf32>,
    return
  }
  func.func @transform_0(%arg0: i32) -> (i32, i32) {
    %c0_i32 = arith.constant 0 : i32
    %c0_i32_0 = arith.constant 0 : i32
    return %arg0, %c0_i32 : i32, i32
  }
  func.func @transform_1(%arg0: i32) -> (i32, i32) {
    %c0_i32 = arith.constant 0 : i32
    %c0_i32_0 = arith.constant 0 : i32
    %c0_i32_1 = arith.constant 0 : i32
    return %c0_i32, %c0_i32_0 : i32, i32
  }
  func.func @transform_2(%arg0: i32) -> (i32, i32) {
    %c0_i32 = arith.constant 0 : i32
    %c0_i32_0 = arith.constant 0 : i32
    %c0_i32_1 = arith.constant 0 : i32
    return %c0_i32, %c0_i32_0 : i32, i32
  }
  func.func @transform_3(%arg0: i32) -> (i32, i32) {
    %c0_i32 = arith.constant 0 : i32
    %c0_i32_0 = arith.constant 0 : i32
    %c0_i32_1 = arith.constant 0 : i32
    return %c0_i32, %c0_i32_0 : i32, i32
  }
  func.func @transform_4(%arg0: i32) -> (i32, i32) {
    %c0_i32 = arith.constant 0 : i32
    %c0_i32_0 = arith.constant 0 : i32
    %c0_i32_1 = arith.constant 0 : i32
    return %c0_i32, %c0_i32_0 : i32, i32
  }
  func.func @transform_5(%arg0: i32) -> (i32, i32) {
    %c0_i32 = arith.constant 0 : i32
    %c0_i32_0 = arith.constant 0 : i32
    %c0_i32_1 = arith.constant 0 : i32
    return %c0_i32, %c0_i32_0 : i32, i32
  }
  func.func @transform_6(%arg0: i32) -> (i32, i32) {
    %c0_i32 = arith.constant 0 : i32
    %c0_i32_0 = arith.constant 0 : i32
    return %arg0, %c0_i32 : i32, i32
  }
}

</mosaic_0001>

<bundles_post_ra>
// kernel: _causal_forward_padded.1
= control target key start
LH: loop header
LB: loop body
LE: loop exit
PB: predicated region body
PF: predicated region fallthrough
CT: control target
= control target key end

     0   :  { %11 = vsyncpa [#allocation3], 0  ;;  %s873_s0 = inlined_call_operand.vmem [shape: f32[16,128], index: 0, kind: input, shape index: {}]   ;;  %s874_s1 = inlined_call_operand.vmem [shape: f32[128,96], index: 1, kind: input, shape index: {}]   ;;  %s875_s2 = inlined_call_operand.vmem [shape: f32[1,96], index: 2, kind: input, shape index: {}]   ;;  %s876_s3 = inlined_call_operand.vmem [shape: f32[64,16], index: 3, kind: input, shape index: {}]   ;;  %s877_s4 = inlined_call_operand.vmem [shape: f32[1,16], index: 4, kind: input, shape index: {}]   ;;  %s878_s5 = inlined_call_operand.vmem [shape: f32[16,32], index: 5, kind: input, shape index: {}]   ;;  %s879_s6 = inlined_call_operand.hbm [shape: f32[16,256], index: 6, kind: output, shape index: {}]  }
   0x1   :  { %13 = vsyncpa [#allocation3 + $0x1], 0  ;;  %s685_s21 = smov 0   ;;  %s687_s22 = smov 0  }
   0x2   :  { %s689_s23 = smov 0   ;;  %s691_s24 = smov 0  }
   0x3 LB: > { %s706_s25 = sadd.s32 4294967295, %s645_s24   ;;  %s521_s26 = sadd.s32 4294967294, %s645_s24   ;;  %s645_s24 = sphi %s691_s24, %s885_s24   ;;  %s641_s23 = sphi %s689_s23, %s884_s23   ;;  %s637_s22 = sphi %s687_s22, %s883_s22   ;;  %s633_s21 = sphi %s685_s21, %s882_s21  }
   0x4   : > { %s710_s27 = sadd.s32 1, %s645_s24   ;;  %s157_s28 = sadd.s32 1, %s641_s23 }
   0x5   : > { %s154_s29 = ssub.s32 %s645_s24, %s710_s27  ;;  %p167_p0 = scmp.ne.s32.totalorder %s641_s23, %s637_s22 }
   0x6   : > { %p155_p1 = scmp.eq.s32.totalorder %s154_s29, 0  ;;  %p168_p2 = scmp.eq.s32.totalorder %s706_s25, 1 }
   0x7   : > { %p173_p3 = scmp.ne.s32.totalorder %s637_s22, %s633_s21  ;;  %p174_p4 = scmp.eq.s32.totalorder %s521_s26, 1 }
   0x8   : > { %s721_s30 = scalar_select %p155_p1, %s641_s23, %s157_s28  }
   0x9   : > { %p723_p5 = por %p168_p2, %p167_p0  ;;  %p727_p6 = por %p174_p4, %p173_p3 }
   0xa   : > { %p524_p7 = scmp.ge.s32.totalorder %s645_s24, 1  ;;  %p214_p8 = scmp.lt.s32.totalorder %s645_s24, 3 }
   0xc   : > { %p215_p9 = pnand %p524_p7, %p214_p8 }
   0xd   : > { %p243_p10 = scmp.lt.s32.totalorder (!%p215_p9), %s706_s25, 1  ;;  %s648_s11 = smov (!%p215_p9), 96  }
   0xe   : > { %218 = sbr.rel (%p215_p9) target bundleno = 950 (0x3b6), region = 44  ;;  %s649_s12 = smov (!%p215_p9), 32  }
   0xf   : > { %s534_s16 = sshll.u32 (!%p215_p9), %s706_s25, 4 }
  0x10   : > { %s457_s19 = scalar_lea.hbm (!%p215_p9), %s879_s6, %s534_s16 }
  0x11   : > { %s461_s26 = sshll.u32 (!%p215_p9), %s457_s19, 4  ;;  %s462_s26 = int_to_ptr.hbm [resolvable:$true] %s461_s26 }
  0x12   : > { %s597_s28 = sshra.s32 (!%p215_p9), %s462_s26, 4  ;;  %s598_s28 = int_to_ptr.hbm [resolvable:$true] %s597_s28 }
  0x13   : > { %v263_v0 = vld [vmem:[%s874_s1 + $0x78] sm:$0xff]  ;;  %v262_v1 = vld [vmem:[%s874_s1 + $0x70] sm:$0xff]  ;;  %v261_v2 = vld [vmem:[%s874_s1 + $0x68] sm:$0xff]  ;;  %s244_s13 = scalar_select %p243_p10, %s706_s25, 1  ;;  %vm296_vm0 = vcmask 523264   ;;  %vm321_vm1 = vcmask 130048  }
  0x14   : > { %268 = vmatpush.msra.mxu0 %v263_v0  ;;  %v260_v3 = vld [vmem:[%s874_s1 + $0x60] sm:$0xff]  ;;  %v295_v4 = vld [vmem:[%s876_s3 + $0x38] sm:$0xff]  ;;  %v294_v5 = vld [vmem:[%s876_s3 + $0x30] sm:$0xff]  ;;  %vm435_vm2 = vcmask 261120   ;;  %vm438_vm3 = vcmask 785408   ;;  %s599_s29 = scalar_lea.hbm %s598_s28, 16  ;;  %p604_p0 = scmp.lt.s32.totalorder %s598_s28, %s879_s6 }
  0x15   : > { %v259_v6 = vld [vmem:[%s874_s1 + $0x58] sm:$0xff]  ;;  %308 = vmatpush.msra.mxu1 %v295_v4  ;;  %v293_v7 = vld [vmem:[%s876_s3 + $0x28] sm:$0xff]  ;;  %v258_v8 = vld [vmem:[%s874_s1 + $0x50] sm:$0xff]  ;;  %s526_s18 = sshll.u32 %s244_s13, 3  ;;  %s240_s13 = sand.u32 1, %s637_s22  }
  0x16   : > { %269 = vmatpush.msra.mxu0 %v262_v1  ;;  %v292_v9 = vld [vmem:[%s876_s3 + $0x20] sm:$0xff]  ;;  %v257_v10 = vld [vmem:[%s874_s1 + $0x48] sm:$0xff]  ;;  %v291_v11 = vld [vmem:[%s876_s3 + $0x18] sm:$0xff]  ;;  %s246_s10 = scalar_lea.vmem %s873_s0, %s526_s18  ;;  %s525_s14 = sshll.u32 %s240_s13, 4 }
  0x17   : > { %309 = vmatpush.msra.mxu1 %v294_v5  ;;  %v256_v12 = vld [vmem:[%s874_s1 + $0x40] sm:$0xff]  ;;  %v290_v13 = vld [vmem:[%s876_s3 + $0x10] sm:$0xff]  ;;  %v255_v14 = vld [vmem:[%s874_s1 + $0x38] sm:$0xff]  ;;  %s242_s15 = scalar_lea.vmem [#allocation2], %s525_s14  ;;  %s446_s25 = scalar_lea.sflag [#allocation3], %s240_s13 }
  0x18   : > { %270 = vmatpush.msra.mxu0 %v261_v2  ;;  %v254_v15 = vld [vmem:[%s874_s1 + $0x30] sm:$0xff]  ;;  %v253_v16 = vld [vmem:[%s874_s1 + $0x28] sm:$0xff]  ;;  %v252_v17 = vld [vmem:[%s874_s1 + $0x20] sm:$0xff]  ;;  %s459_s20 = sshll.u32 %s242_s15, 4  ;;  %p600_p11 = scmp.ne.s32.totalorder %s598_s28, %s599_s29  ;;  %s460_s20 = int_to_ptr.vmem [resolvable:$true] %s459_s20 }
  0x19   : > { %310 = vmatpush.msra.mxu1 %v293_v7  ;;  %v251_v18 = vld [vmem:[%s874_s1 + $0x18] sm:$0xff]  ;;  %v250_v19 = vld [vmem:[%s874_s1 + $0x10] sm:$0xff]  ;;  %v249_v20 = vld [vmem:[%s874_s1 + $0x8] sm:$0xff] }
  0x1a   : > { %271 = vmatpush.msra.mxu0 %v260_v3  ;;  %v248_v21 = vld [vmem:[%s874_s1] sm:$0xff]  ;;  %v289_v23 = vld [vmem:[%s876_s3 + $0x8] sm:$0xff]  ;;  %p601_p12 = pnand %p600_p11, %p723_p5 }
  0x1b   : > { %311 = vmatpush.msra.mxu1 %v292_v9  ;;  %v247_v22 = vld [vmem:[%s246_s10] sm:$0xff]  ;;  %v339_v36 = vld [vmem:[%s878_s5 + $0x8] sm:$0xff]  ;;  %s647_s10 = smov 64  }
  0x1c   : > { %272 = vmatpush.msra.mxu0 %v259_v6  ;;  %v288_v24 = vld [vmem:[%s876_s3] sm:$0xff]  ;;  %357 = vmatpush.msra.mxu2 %v339_v36  ;;  %p602_p13 = pneg %p601_p12 }
  0x1d   : > { %312 = vmatpush.msra.mxu1 %v291_v11  ;;  %v577_v25 = vld [vmem:[%s875_s2] ss:$0 sm:$0xff] }
  0x1e   : > { %273 = vmatpush.msra.mxu0 %v258_v8  ;;  %v338_v37 = vld [vmem:[%s878_s5] sm:$0xff] }
  0x1f   : > { %313 = vmatpush.msra.mxu1 %v290_v13  ;;  %358 = vmatpush.msra.mxu2 %v338_v37  ;;  %v578_v39 = vld [vmem:[%s877_s4] ss:$0 sm:$0xff] }
  0x20   : > { %274 = vmatpush.msra.mxu0 %v257_v10 }
  0x21   : > { %314 = vmatpush.msra.mxu1 %v289_v23 }
  0x22   : > { %275 = vmatpush.msra.mxu0 %v256_v12 }
  0x23   : > { %315 = vmatpush.msra.mxu1 %v288_v24 }
  0x24   : > { %276 = vmatpush.msra.mxu0 %v255_v14 }
  0x26   : > { %277 = vmatpush.msra.mxu0 %v254_v15 }
  0x28   : > { %278 = vmatpush.msra.mxu0 %v253_v16 }
  0x2a   : > { %279 = vmatpush.msra.mxu0 %v252_v17 }
  0x2c   : > { %280 = vmatpush.msra.mxu0 %v251_v18 }
  0x2e   : > { %281 = vmatpush.msra.mxu0 %v250_v19 }
  0x30   : > { %282 = vmatpush.msra.mxu0 %v249_v20 }
  0x32   : > { %283 = vmatpush.msra.mxu0 %v248_v21 }
  0x33   : > { %284 = vmatmul.f32.vlgmr.msra.gmra.mxu0 %v247_v22 }
  0xb0   : > { %v285_v26 = vpop.f32.mrf.mxu0 }
  0xb1   : > { %v813_v27 = vadd.f32 %v577_v25, %v285_v26 }
  0xb3   : > { %527 = vmatmul.msk.f32.vlgmr.msra.gmra.mxu1 %vm296_vm0, %v813_v27 }
 0x130   : > { %v317_v28 = vpop.f32.mrf.mxu1 }
 0x131   : > { %v320_v29 = vmul.f32 0.125, %v317_v28 }
 0x133   : > { %v322_v30 = vsel %vm321_vm1, %v320_v29, -inf }
 0x134   : > { %323 = vmax.xlane.f32.xlu0 %v322_v30 }
 0x1a7   : > { %v324_v31 = vpop.xlane.xlu0 %323 }
 0x1a8   : > { %v325_v32 = vsub.f32 %v320_v29, %v324_v31 }
 0x1aa   : > { %v326_v33 = vmul.f32 1.442695, %v325_v32 }
 0x1ac   : > { %579 = vpow2.f32 %v326_v33 }
 0x1b2   : > { %v580_v34 = vpop.eup %579 }
 0x1b3   : > { %v328_v35 = vsel %vm321_vm1, %v580_v34, 0.0 }
 0x1b4   : > { %329 = vadd.xlane.f32.xlu0 %v328_v35 }
 0x227   : > { %v330_v38 = vpop.xlane.xlu0 %329 }
 0x228   : > { %581 = vrcp.f32 %v330_v38 }
 0x22e   : > { %v582_v40 = vpop.eup %581 }
 0x22f   : > { %v332_v41 = vmul.f32 %v582_v40, %v580_v34 }
 0x231   : > { %v337_v42 = vmul.f32 %v578_v39, %v332_v41 }
 0x233   : > { %528 = vmatmul.msk.f32.vlgmr.msra.gmra.mxu2 %vm321_vm1, %v337_v42 }
 0x2b6   : > { %v360_v43 = vpop.f32.mrf.mxu2 }
 0x2b7   : > { %v387_v44 = vperm.slane %v360_v43, 4  ;;  %v381_v45 = vperm.slane %v360_v43, 3  ;;  %v363_v46 = vperm.slane %v360_v43, 0  ;;  %v393_v47 = vperm.slane %v360_v43, 5 }
 0x2b8   : > { %v369_v48 = vperm.slane %v360_v43, 1  ;;  %v375_v49 = vperm.slane %v360_v43, 2  ;;  %v405_v50 = vperm.slane %v360_v43, 7  ;;  %v399_v51 = vperm.slane %v360_v43, 6 }
 0x2b9   : > { %389 = vrot.lane.b32.xlu2 %v387_v44, %s647_s10  ;;  %383 = vrot.lane.b32.xlu0 %v381_v45, %s647_s10 }
 0x2ba   : > { %365 = vrot.lane.b32.xlu1 %v363_v46, %s647_s10 }
 0x2c1   : > { %395 = vrot.lane.b32.xlu2 %v393_v47, %s647_s10 }
 0x2c2   : > { %371 = vrot.lane.b32.xlu1 %v369_v48, %s647_s10 }
 0x2c9   : > { %377 = vrot.lane.b32.xlu2 %v375_v49, %s647_s10 }
 0x2ca   : > { %407 = vrot.lane.b32.xlu1 %v405_v50, %s647_s10 }
 0x2d2   : > { %401 = vrot.lane.b32.xlu1 %v399_v51, %s647_s10 }
 0x313   : > { %v390_v52 = vpop.permute.xlu2 %389 }
 0x314   : > { %v392_v58 = vadd.f32 %v390_v52, %v813_v27 }
 0x31b   : > { %v396_v53 = vpop.permute.xlu2 %395 }
 0x31c   : > { %v398_v54 = vadd.f32 %v396_v53, %v813_v27 }
 0x31e   : > { %428 = vrot.lane.b32.xlu0 %v398_v54, %s648_s11 }
 0x323   : > { %v378_v0 = vpop.permute.xlu2 %377 }
 0x324   : > { %v380_v12 = vadd.f32 %v378_v0, %v813_v27 }
 0x32b   : > { %v384_v60 = vpop.permute.xlu0 %383 }
 0x32c   : > { %v366_v55 = vpop.permute.xlu1 %365  ;;  %v386_v62 = vadd.f32 %v384_v60, %v813_v27 }
 0x32d   : > { %v368_v56 = vadd.f32 %v366_v55, %v813_v27 }
 0x32f   : > { %412 = vrot.lane.b32.xlu2 %v368_v56, %s647_s10 }
 0x334   : > { %v372_v57 = vpop.permute.xlu1 %371 }
 0x335   : > { %v374_v59 = vadd.f32 %v372_v57, %v813_v27 }
 0x337   : > { %424 = vrot.lane.b32.xlu2 %v392_v58, %s647_s10  ;;  %416 = vrot.lane.b32.xlu1 %v374_v59, %s648_s11  ;;  %s603_s11 = scalar_lea.hbm %s879_s6, 32 }
 0x338   : > { %p605_p1 = scmp.lt.s32.totalorder %s603_s11, %s599_s29 }
 0x33a   : > { %p606_p2 = por %p605_p1, %p604_p0 }
 0x33c   : > { %v408_v61 = vpop.permute.xlu1 %407  ;;  %p607_p3 = pnand %p606_p2, %p602_p13 }
 0x33d   : > { %v410_v63 = vadd.f32 %v408_v61, %v813_v27 }
 0x33f   : > { %420 = vrot.lane.b32.xlu1 %v386_v62, %s649_s12  ;;  %432 = vrot.lane.b32.xlu2 %v410_v63, %s649_s12 }
 0x344   : > { %v402_v4 = vpop.permute.xlu1 %401 }
 0x345   : > { %v404_v6 = vadd.f32 %v402_v4, %v813_v27 }
 0x389   : > { %v413_v1 = vpop.permute.xlu2 %412 }
 0x390   : > { %v429_v3 = vpop.permute.xlu0 %428 }
 0x391   : > { %v425_v2 = vpop.permute.xlu2 %424 }
 0x392   : > { %v440_v5 = vsel %vm435_vm2, %v425_v2, %v429_v3 }
 0x393   : > { %v441_v8 = vsel %vm296_vm0, %v440_v5, %v404_v6 }
 0x399   : > { %v433_v7 = vpop.permute.xlu2 %432 }
 0x39a   : > { %v442_v9 = vsel %vm438_vm3, %v441_v8, %v433_v7 }
 0x39b   : > { %444 = vst [vmem:[%s242_s15 + $0x8] sm:$0xff] %v442_v9 }
 0x3a9   : > { %v417_v10 = vpop.permute.xlu1 %416 }
 0x3aa   : > { %v436_v11 = vsel %vm435_vm2, %v413_v1, %v417_v10 }
 0x3ab   : > { %v437_v13 = vsel %vm296_vm0, %v436_v11, %v380_v12 }
 0x3b1   : > { %v421_v14 = vpop.permute.xlu1 %420 }
 0x3b2   : > { %v439_v15 = vsel %vm438_vm3, %v437_v13, %v421_v14 }
 0x3b3   : > { %443 = vst [vmem:[%s242_s15] sm:$0xff] %v439_v15 }
 0x3b4   : > { %610 = shalt.err (!%p607_p3)
}
 0x3b5   : > { %535 = dma.vmem_to_hbm [thread:$0]  (%p723_p5), %s460_s20, 256, %s462_s26, %s446_s25  }
 0x3b6 PF: > { %p541_p4 = scmp.ge.s32.totalorder %s645_s24, 2  ;;  %s473_s13 = sand.u32 1, %s633_s21  }
 0x3b7   : > { %s474_s15 = scalar_lea.sflag [#allocation3], %s473_s13 }
 0x3b8   : > { %p538_p7 = pnand %p541_p4, %p727_p6 }
 0x3ba   : > { %p539_p8 = pneg %p538_p7 }
 0x3bc   : > { %628 = dma.done.wait (%p539_p8), %s474_s15, 256  }
 0x3bd   : > { %630 = vsyncadd (%p539_p8), %s474_s15, 4294967040  ;;  %p16_p9 = scmp.ge.s32.totalorder %s710_s27, 4   ;;  %s882_s21 = smov %s637_s22 }
 0x3be   : > { %s883_s22 = smov %s641_s23  ;;  %s884_s23 = smov %s721_s30 }
 0x3bf   : > { %s885_s24 = smov %s710_s27  ;;  %18 = sbr.rel (!%p16_p9) target bundleno = 3 (0x3), region = 79 }
 0x3c4   :  { %480 = vsyncpa [#allocation3], 1 }
 0x3c5   :  { %482 = vsyncpa [#allocation3 + $0x1], 1 }

</bundles_post_ra>
